<compile_context>
chip_gen: v7x
topology: tpu7x:2x2x1
jax: 0.10.0
libtpu: 0.0.40
codegen_flags: <defaults>
</compile_context>

<pallas_src>
import functools

import jax
import jax.numpy as jnp
from jax.experimental import pallas as pl
from jax.experimental.pallas import tpu as pltpu


def _round_up(a: int, m: int) -> int:
    return ((a + m - 1) // m) * m


# ---------------------------------------------------------------------------
# Stage 1 (init, one-time): proj = table @ W^T + b over the padded table.
# ---------------------------------------------------------------------------
def _project_table_kernel(tab_ref, w_ref, b_ref, o_ref):
    # tab_ref: (TV, Ep)   bf16  block of embedding rows
    # w_ref:   (Ep, Dcol) bf16  transposed Linear weight (grid-resident)
    # b_ref:   (1,  Dcol) f32   bias (grid-resident)
    # o_ref:   (TV, Dcol) bf16  projected rows
    acc = jnp.dot(tab_ref[...], w_ref[...], preferred_element_type=jnp.float32)
    o_ref[...] = (acc + b_ref[...]).astype(o_ref.dtype)


def init_roadnet_embedding(table, w_pt, b):
    """One-time projection of the frozen embedding table.

    table: (V, E) f32 pretrained embeddings (rows 0/1 are the zero pad rows).
    w_pt:  (D, E) nn.Linear weight;  b: (D,) bias.
    Returns `proj` (Vp, Dcol) bf16 to be passed to `roadnet_embedding`.
    """
    V, E = map(int, table.shape)
    D = int(w_pt.shape[0])

    # Column width of the projected table:
    #   D multiple of 128       -> Dcol = D   (already lane dense)
    #   128 % D == 0, D < 128   -> Dcol = D   (128 // D tokens packed per output row)
    #   otherwise               -> Dcol = round_up(D, 128) (fallback; wrapper slices)
    if D % 128 == 0 or 128 % D == 0:
        Dcol = D
    else:
        Dcol = _round_up(D, 128)

    Ep = _round_up(E, 128)
    Vp = _round_up(V, 128)
    TV = 512 if Vp % 512 == 0 else (256 if Vp % 256 == 0 else 128)

    table_p = jnp.zeros((Vp, Ep), jnp.bfloat16).at[:V, :E].set(
        jnp.asarray(table, jnp.bfloat16))
    w_ed = jnp.zeros((Ep, Dcol), jnp.bfloat16).at[:E, :D].set(
        jnp.asarray(w_pt, jnp.bfloat16).T)
    b_p = jnp.zeros((1, Dcol), jnp.float32).at[0, :D].set(
        jnp.asarray(b, jnp.float32))

    proj = pl.pallas_call(
        _project_table_kernel,
        out_shape=jax.ShapeDtypeStruct((Vp, Dcol), jnp.bfloat16),
        grid=(Vp // TV,),
        in_specs=[
            pl.BlockSpec((TV, Ep), lambda i: (i, 0)),
            pl.BlockSpec((Ep, Dcol), lambda i: (0, 0)),
            pl.BlockSpec((1, Dcol), lambda i: (0, 0)),
        ],
        out_specs=pl.BlockSpec((TV, Dcol), lambda i: (i, 0)),
        compiler_params=pltpu.CompilerParams(dimension_semantics=("parallel",)),
    )(table_p, w_ed, b_p)
    return proj


# ---------------------------------------------------------------------------
# Stage 2 (hot path): batched gather of projected rows via one-hot MXU matmul.
# ---------------------------------------------------------------------------
def _gather_kernel(idx_ref, proj_ref, o_ref, *, num_valid_rows, vchunk):
    # idx_ref:  (Trows, P)        int32  P token ids per output row
    # proj_ref: (Vp, Dcol)        bf16   projected table, VMEM-resident (Buffered(1))
    # o_ref:    (Trows, P * Dcol) f32    packed, lane-dense output block
    Trows, P = idx_ref.shape
    Vp, Dcol = proj_ref.shape
    nchunks = Vp // vchunk

    for p in range(P):  # static; P = 128 // D (e.g. 2 for D=64), else 1
        ids = jnp.clip(idx_ref[:, p:p + 1], 0, num_valid_rows - 1)      # (Trows, 1)

        if nchunks == 1:
            lanes = jax.lax.broadcasted_iota(jnp.int32, (Trows, Vp), 1)
            onehot = (ids == lanes).astype(jnp.bfloat16)
            acc = jnp.dot(onehot, proj_ref[...],
                          preferred_element_type=jnp.float32)
        else:
            def chunk_body(c, acc):
                off = c * vchunk
                lanes = jax.lax.broadcasted_iota(
                    jnp.int32, (Trows, vchunk), 1) + off
                onehot = (ids == lanes).astype(jnp.bfloat16)
                blk = proj_ref[pl.ds(pl.multiple_of(off, vchunk), vchunk), :]
                return acc + jnp.dot(onehot, blk,
                                     preferred_element_type=jnp.float32)

            acc = jax.lax.fori_loop(0, nchunks, chunk_body,
                                    jnp.zeros((Trows, Dcol), jnp.float32))

        o_ref[:, p * Dcol:(p + 1) * Dcol] = acc.astype(o_ref.dtype)


@functools.partial(jax.jit, static_argnames=("num_embeddings", "d_input", "tile_tokens"))
def roadnet_embedding(x, proj, *, num_embeddings, d_input, tile_tokens=512):
    """Hot path: x (B, S) int ids + precomputed proj -> (B, S, d_input) f32."""
    B, S = x.shape
    Vp, Dcol = proj.shape
    D = d_input

    # Tokens packed per 128-lane output row (only when init kept Dcol == D < 128).
    P = (128 // D) if (Dcol == D and D < 128) else 1
    assert tile_tokens % P == 0
    Trows = tile_tokens // P
    vchunk = 256 if Vp % 256 == 0 else 128          # 256-wide K chunks on v6e/v7x MXU
    vchunk = min(vchunk, Vp)

    N = B * S
    nrows = -(-N // P)
    nrows_p = _round_up(max(nrows, 1), Trows)

    idx_flat = x.reshape(-1).astype(jnp.int32)
    idx2d = jnp.zeros((nrows_p * P,), jnp.int32).at[:N].set(idx_flat)
    idx2d = idx2d.reshape(nrows_p, P)

    out = pl.pallas_call(
        functools.partial(_gather_kernel,
                          num_valid_rows=num_embeddings, vchunk=vchunk),
        out_shape=jax.ShapeDtypeStruct((nrows_p, P * Dcol), jnp.float32),
        grid=(nrows_p // Trows,),
        in_specs=[
            pl.BlockSpec((Trows, P), lambda i: (i, 0)),
            # Grid-invariant resident table: single-buffered (halves VMEM footprint).
            pl.BlockSpec((Vp, Dcol), lambda i: (0, 0),
                         pipeline_mode=pl.Buffered(1)),
        ],
        out_specs=pl.BlockSpec((Trows, P * Dcol), lambda i: (i, 0)),
        compiler_params=pltpu.CompilerParams(
            dimension_semantics=("parallel",),        # independent tiles (v7x 2 TCs)
            vmem_limit_bytes=48 * 1024 * 1024,        # headroom under v7x's 64 MiB
        ),
    )(idx2d, proj)

    if Dcol == D:
        flat = out.reshape(-1)                        # packed rows -> contiguous tokens
        if nrows_p * P == N:
            return flat.reshape(B, S, D)
        return flat[:N * D].reshape(B, S, D)
    # Fallback (D not 128-friendly): padded columns, slice them off.
    return out[:N, :D].reshape(B, S, D)


# ---------------------------------------------------------------------------
# Demo / self-test
# ---------------------------------------------------------------------------
def _reference(x, table, w_pt, b):
    return jnp.take(table, x, axis=0) @ w_pt.T + b


def _run_case(key, *, num_nodes, E, D, B, S):
    k_tab, k_w, k_b, k_x = jax.random.split(key, 4)
    node_emb = jax.random.normal(k_tab, (num_nodes, E), dtype=jnp.float32)
    # _get_weight prepends two all-zero rows to the pretrained node embeddings.
    table = jnp.concatenate([jnp.zeros((2, E), jnp.float32), node_emb], axis=0)
    V = table.shape[0]
    w_pt = jax.random.normal(k_w, (D, E), dtype=jnp.float32) * (1.0 / jnp.sqrt(E))
    b = jax.random.normal(k_b, (D,), dtype=jnp.float32) * 0.01
    x = jax.random.randint(k_x, (B, S), minval=0, maxval=V, dtype=jnp.int32)

    proj = init_roadnet_embedding(table, w_pt, b)          # one-time cold path
    out = roadnet_embedding(x, proj, num_embeddings=V, d_input=D)
    out = jax.block_until_ready(out)

    ref = _reference(x, table, w_pt, b)
    assert out.shape == (B, S, D), out.shape
    err = float(jnp.max(jnp.abs(out - ref)))
    assert jnp.allclose(out, ref, atol=2e-2, rtol=2e-2), err


if __name__ == "__main__":
    key = jax.random.PRNGKey(0)
    k0, k1 = jax.random.split(key)
    # Module-like config: 64 nodes (+2 zero rows), E=128, project to D=64.
    # Exercises the packed (2 tokens per 128-lane row), single-chunk path.
    _run_case(k0, num_nodes=64, E=128, D=64, B=2, S=8)
    # Larger vocab / awkward D: exercises the chunked contraction (fori_loop)
    # and the padded-column fallback.
    _run_case(k1, num_nodes=298, E=96, D=96, B=2, S=8)
    print("KERNEL_OK")
</pallas_src>

<mosaic_0001>
module attributes {stable_mosaic.version = 11 : i64} {
  func.func @_project_table_kernel(%arg0: i32, %arg1: memref<128x128xbf16, #tpu.memory_space<vmem>>, %arg2: memref<128x64xbf16, #tpu.memory_space<vmem>>, %arg3: memref<1x64xf32, #tpu.memory_space<vmem>>, %arg4: memref<128x64xbf16, #tpu.memory_space<vmem>>) attributes {dimension_semantics = [#tpu.dimension_semantics<parallel>], iteration_bounds = array<i64: 1>, scalar_prefetch = 0 : i64, scratch_operands = 0 : i64, tpu.core_type = #tpu.core_type<tc>, window_params = [{transform_indices = @transform_0, window_bounds = array<i64: 128, 128>}, {pipeline_mode = #tpu.pipeline_mode<synchronous>, transform_indices = @transform_1, window_bounds = array<i64: 128, 64>}, {pipeline_mode = #tpu.pipeline_mode<synchronous>, transform_indices = @transform_2, window_bounds = array<i64: 1, 64>}, {transform_indices = @transform_3, window_bounds = array<i64: 128, 64>}]} {
    %c0 = arith.constant 0 : index
    %c0_0 = arith.constant 0 : index
    %0 = vector.load %arg1[%c0, %c0_0] : memref<128x128xbf16, #tpu.memory_space<vmem>>, vector<128x128xbf16>
    %c0_1 = arith.constant 0 : index
    %c0_2 = arith.constant 0 : index
    %1 = vector.load %arg2[%c0_1, %c0_2] : memref<128x64xbf16, #tpu.memory_space<vmem>>, vector<128x64xbf16>
    %cst = arith.constant dense<0.000000e+00> : vector<128x64xf32>
    %2 = tpu.matmul %0, %1, %cst {dimension_numbers = #tpu.dot_dimension_numbers<[1], [0], [0], [1], [0, 0, 1, 1], [], []>} : vector<128x128xbf16>, vector<128x64xbf16>, vector<128x64xf32> -> vector<128x64xf32>
    %c0_3 = arith.constant 0 : index
    %c0_4 = arith.constant 0 : index
    %3 = vector.load %arg3[%c0_3, %c0_4] : memref<1x64xf32, #tpu.memory_space<vmem>>, vector<1x64xf32>
    %4 = vector.broadcast %3 : vector<1x64xf32> to vector<128x64xf32>
    %5 = arith.addf %2, %4 : vector<128x64xf32>
    %6 = arith.truncf %5 : vector<128x64xf32> to vector<128x64xbf16>
    %c0_5 = arith.constant 0 : index
    %c0_6 = arith.constant 0 : index
    %7 = vector.load %arg4[%c0_5, %c0_6] : memref<128x64xbf16, #tpu.memory_space<vmem>>, vector<128x64xbf16>
    tpu.vector_store %arg4[%c0_5, %c0_6], %6 {strides = array<i32>} : memref<128x64xbf16, #tpu.memory_space<vmem>>, vector<128x64xbf16>,
    return
  }
  func.func @transform_0(%arg0: i32) -> (i32, i32) {
    %c0_i32 = arith.constant 0 : i32
    %c0_i32_0 = arith.constant 0 : i32
    return %arg0, %c0_i32 : i32, i32
  }
  func.func @transform_1(%arg0: i32) -> (i32, i32) {
    %c0_i32 = arith.constant 0 : i32
    %c0_i32_0 = arith.constant 0 : i32
    %c0_i32_1 = arith.constant 0 : i32
    return %c0_i32, %c0_i32_0 : i32, i32
  }
  func.func @transform_2(%arg0: i32) -> (i32, i32) {
    %c0_i32 = arith.constant 0 : i32
    %c0_i32_0 = arith.constant 0 : i32
    %c0_i32_1 = arith.constant 0 : i32
    return %c0_i32, %c0_i32_0 : i32, i32
  }
  func.func @transform_3(%arg0: i32) -> (i32, i32) {
    %c0_i32 = arith.constant 0 : i32
    %c0_i32_0 = arith.constant 0 : i32
    return %arg0, %c0_i32 : i32, i32
  }
}

</mosaic_0001>

<bundles_post_ra>
// kernel: tpu_custom_call.1
= control target key start
LH: loop header
LB: loop body
LE: loop exit
PB: predicated region body
PF: predicated region fallthrough
CT: control target
= control target key end

     0   :  { %vm311_vm0 = vcmask 519168   ;;  %s596_s1 = inlined_call_operand.vmem [shape: bf16[128,64], index: 1, kind: input, shape index: {}]   ;;  %s597_s0 = inlined_call_operand.vmem [shape: bf16[128,128], index: 0, kind: input, shape index: {}]   ;;  %s598_s2 = inlined_call_operand.vmem [shape: f32[1,64], index: 2, kind: input, shape index: {}]   ;;  %s599_s3 = inlined_call_operand.vmem [shape: bf16[128,64], index: 3, kind: output, shape index: {}]  }
   0x1   :  { %v445_v0 = vld [vmem:[%s596_s1] sm:$0xff]   ;;  %v446_v1 = vld [vmem:[%s596_s1 + $0x8] sm:$0xff]   ;;  %v447_v2 = vld [vmem:[%s596_s1 + $0x10] sm:$0xff]  }
   0x2   :  { %397 = vmatprep.subr.bf16.mxu0 %v445_v0  ;;  %429 = vmatprep.subr.bf16.mxu1 %v445_v0  ;;  %v448_v3 = vld [vmem:[%s596_s1 + $0x18] sm:$0xff]   ;;  %v453_v4 = vld [vmem:[%s597_s0] sm:$0xff]   ;;  %v450_v7 = vld [vmem:[%s596_s1 + $0x28] sm:$0xff]  }
   0x3   :  { %398 = vmatpush3.bf16.msra.mxu0 %v445_v0  ;;  %437 = vmatpush3.bf16.msra.mxu1 %v445_v0  ;;  %v454_v5 = vld [vmem:[%s597_s0 + $0x20] sm:$0xff]   ;;  %v451_v8 = vld [vmem:[%s596_s1 + $0x30] sm:$0xff]   ;;  %v452_v9 = vld [vmem:[%s596_s1 + $0x38] sm:$0xff]  }
   0x4   :  { %399 = vmatprep.subr.bf16.mxu0 %v446_v1  ;;  %430 = vmatprep.subr.bf16.mxu1 %v446_v1  ;;  %v449_v6 = vld [vmem:[%s596_s1 + $0x20] sm:$0xff]   ;;  %v455_v10 = vld [vmem:[%s597_s0 + $0x8] sm:$0xff]   ;;  %v457_v12 = vld [vmem:[%s597_s0 + $0x10] sm:$0xff]  }
   0x5   :  { %413 = vmatprep.mubr.bf16.mxu0 %v453_v4  ;;  %421 = vmatprep.mubr.bf16.mxu1 %v454_v5  ;;  %v456_v11 = vld [vmem:[%s597_s0 + $0x28] sm:$0xff]   ;;  %v458_v13 = vld [vmem:[%s597_s0 + $0x30] sm:$0xff]   ;;  %v459_v14 = vld [vmem:[%s597_s0 + $0x18] sm:$0xff]  }
   0x6   :  { %v460_v15 = vld [vmem:[%s597_s0 + $0x38] sm:$0xff]   ;;  %v332_v16 = vld [vmem:[%s598_s2] ss:$0 sm:$0xff] }
   0x7   :  { %400 = vmatpush3.bf16.msra.mxu0 %v446_v1  ;;  %438 = vmatpush3.bf16.msra.mxu1 %v446_v1 }
   0x8   :  { %401 = vmatprep.subr.bf16.mxu0 %v447_v2  ;;  %431 = vmatprep.subr.bf16.mxu1 %v447_v2 }
   0xb   :  { %402 = vmatpush3.bf16.msra.mxu0 %v447_v2  ;;  %439 = vmatpush3.bf16.msra.mxu1 %v447_v2 }
   0xc   :  { %403 = vmatprep.subr.bf16.mxu0 %v448_v3  ;;  %432 = vmatprep.subr.bf16.mxu1 %v448_v3 }
   0xf   :  { %404 = vmatpush3.bf16.msra.mxu0 %v448_v3  ;;  %440 = vmatpush3.bf16.msra.mxu1 %v448_v3 }
  0x10   :  { %405 = vmatprep.subr.bf16.mxu0 %v449_v6  ;;  %433 = vmatprep.subr.bf16.mxu1 %v449_v6 }
  0x13   :  { %406 = vmatpush3.bf16.msra.mxu0 %v449_v6  ;;  %441 = vmatpush3.bf16.msra.mxu1 %v449_v6 }
  0x14   :  { %407 = vmatprep.subr.bf16.mxu0 %v450_v7  ;;  %434 = vmatprep.subr.bf16.mxu1 %v450_v7 }
  0x17   :  { %408 = vmatpush3.bf16.msra.mxu0 %v450_v7  ;;  %442 = vmatpush3.bf16.msra.mxu1 %v450_v7 }
  0x18   :  { %409 = vmatprep.subr.bf16.mxu0 %v451_v8  ;;  %435 = vmatprep.subr.bf16.mxu1 %v451_v8 }
  0x1b   :  { %410 = vmatpush3.bf16.msra.mxu0 %v451_v8  ;;  %443 = vmatpush3.bf16.msra.mxu1 %v451_v8 }
  0x1c   :  { %411 = vmatprep.subr.bf16.mxu0 %v452_v9  ;;  %436 = vmatprep.subr.bf16.mxu1 %v452_v9 }
  0x1f   :  { %412 = vmatpush3.bf16.msra.mxu0 %v452_v9  ;;  %444 = vmatpush3.bf16.msra.mxu1 %v452_v9 }
  0x22   :  { %414 = vmatmul.mubr.bf16.vlgmr.msra.gmra.mrb[0].mxu0 %v455_v10  ;;  %422 = vmatmul.mubr.bf16.vlgmr.msra.gmra.mrb[0].mxu1 %v456_v11 }
  0x23   :  { %417 = vmatprep.mubr.bf16.mxu0 %v457_v12  ;;  %425 = vmatprep.mubr.bf16.mxu1 %v458_v13 }
  0x2a   :  { %418 = vmatmul.mubr.bf16.gmra.mrb[4].mxu0 %v459_v14  ;;  %426 = vmatmul.mubr.bf16.gmra.mrb[4].mxu1 %v460_v15 }
  0xf5   :  { %v415_v17 = vpop.f32.mrb[0].mxu0  ;;  %v423_v18 = vpop.f32.mrb[0].mxu1 }
  0xf6   :  { %v193_v19 = vadd.f32 %v415_v17, %v332_v16  ;;  %v225_v20 = vadd.f32 %v423_v18, %v332_v16  ;;  %v184_v21 = vpop.f32.mrb[1].mxu0  ;;  %v216_v22 = vpop.f32.mrb[1].mxu1 }
  0xf7   :  { %v185_v23 = vadd.f32 %v332_v16, %v184_v21  ;;  %v217_v24 = vadd.f32 %v332_v16, %v216_v22  ;;  %v416_v25 = vpop.f32.mrb[2].mxu0  ;;  %v424_v26 = vpop.f32.mrb[2].mxu1 }
  0xf8   :  { %v367_v27 = vpack.c.bf16 %v193_v19, %v193_v19  ;;  %v375_v28 = vpack.c.bf16 %v225_v20, %v225_v20  ;;  %v196_v29 = vadd.f32 %v416_v25, %v332_v16  ;;  %v228_v30 = vadd.f32 %v424_v26, %v332_v16  ;;  %v187_v31 = vpop.f32.mrb[3].mxu0  ;;  %v219_v32 = vpop.f32.mrb[3].mxu1 }
  0xf9   :  { %v365_v33 = vpack.c.bf16 %v185_v23, %v185_v23  ;;  %v373_v34 = vpack.c.bf16 %v217_v24, %v217_v24  ;;  %v188_v35 = vadd.f32 %v332_v16, %v187_v31  ;;  %v220_v36 = vadd.f32 %v332_v16, %v219_v32 }
  0xfa   :  { %314 = vst.msk [vmem:[%s599_s3 + $0x8] sm:$0xf] %vm311_vm0, %v367_v27  ;;  %322 = vst.msk [vmem:[%s599_s3 + $0x28] sm:$0xf] %vm311_vm0, %v375_v28  ;;  %v368_v37 = vpack.c.bf16 %v196_v29, %v196_v29  ;;  %v376_v38 = vpack.c.bf16 %v228_v30, %v228_v30 }
  0xfb   :  { %312 = vst.msk [vmem:[%s599_s3] sm:$0xf] %vm311_vm0, %v365_v33  ;;  %320 = vst.msk [vmem:[%s599_s3 + $0x20] sm:$0xf] %vm311_vm0, %v373_v34  ;;  %v366_v39 = vpack.c.bf16 %v188_v35, %v188_v35  ;;  %v374_v40 = vpack.c.bf16 %v220_v36, %v220_v36 }
  0xfc   :  { %315 = vst.msk [vmem:[%s599_s3 + $0xc] sm:$0xf] %vm311_vm0, %v368_v37  ;;  %323 = vst.msk [vmem:[%s599_s3 + $0x2c] sm:$0xf] %vm311_vm0, %v376_v38 }
  0xfd   :  { %313 = vst.msk [vmem:[%s599_s3 + $0x4] sm:$0xf] %vm311_vm0, %v366_v39  ;;  %321 = vst.msk [vmem:[%s599_s3 + $0x24] sm:$0xf] %vm311_vm0, %v374_v40  ;;  %v419_v41 = vpop.f32.mrb[4].mxu0  ;;  %v427_v42 = vpop.f32.mrb[4].mxu1 }
  0xfe   :  { %v209_v43 = vadd.f32 %v419_v41, %v332_v16  ;;  %v241_v44 = vadd.f32 %v427_v42, %v332_v16  ;;  %v200_v45 = vpop.f32.mrb[5].mxu0  ;;  %v232_v46 = vpop.f32.mrb[5].mxu1 }
  0xff   :  { %v201_v47 = vadd.f32 %v332_v16, %v200_v45  ;;  %v233_v48 = vadd.f32 %v332_v16, %v232_v46  ;;  %v420_v49 = vpop.f32.mrb[6].mxu0  ;;  %v428_v50 = vpop.f32.mrb[6].mxu1 }
 0x100   :  { %v371_v51 = vpack.c.bf16 %v209_v43, %v209_v43  ;;  %v379_v52 = vpack.c.bf16 %v241_v44, %v241_v44  ;;  %v212_v53 = vadd.f32 %v420_v49, %v332_v16  ;;  %v244_v54 = vadd.f32 %v428_v50, %v332_v16  ;;  %v203_v55 = vpop.f32.mrb[7].mxu0  ;;  %v235_v56 = vpop.f32.mrb[7].mxu1 }
 0x101   :  { %v369_v57 = vpack.c.bf16 %v201_v47, %v201_v47  ;;  %v377_v58 = vpack.c.bf16 %v233_v48, %v233_v48  ;;  %v204_v59 = vadd.f32 %v332_v16, %v203_v55  ;;  %v236_v60 = vadd.f32 %v332_v16, %v235_v56 }
 0x102   :  { %318 = vst.msk [vmem:[%s599_s3 + $0x18] sm:$0xf] %vm311_vm0, %v371_v51  ;;  %326 = vst.msk [vmem:[%s599_s3 + $0x38] sm:$0xf] %vm311_vm0, %v379_v52  ;;  %v372_v61 = vpack.c.bf16 %v212_v53, %v212_v53  ;;  %v380_v62 = vpack.c.bf16 %v244_v54, %v244_v54 }
 0x103   :  { %316 = vst.msk [vmem:[%s599_s3 + $0x10] sm:$0xf] %vm311_vm0, %v369_v57  ;;  %324 = vst.msk [vmem:[%s599_s3 + $0x30] sm:$0xf] %vm311_vm0, %v377_v58  ;;  %v370_v63 = vpack.c.bf16 %v204_v59, %v204_v59  ;;  %v378_v0 = vpack.c.bf16 %v236_v60, %v236_v60 }
 0x104   :  { %319 = vst.msk [vmem:[%s599_s3 + $0x1c] sm:$0xf] %vm311_vm0, %v372_v61  ;;  %327 = vst.msk [vmem:[%s599_s3 + $0x3c] sm:$0xf] %vm311_vm0, %v380_v62 }
 0x105   :  { %317 = vst.msk [vmem:[%s599_s3 + $0x14] sm:$0xf] %vm311_vm0, %v370_v63  ;;  %325 = vst.msk [vmem:[%s599_s3 + $0x34] sm:$0xf] %vm311_vm0, %v378_v0 }

</bundles_post_ra>
